<compile_context>
chip_gen: v7x
topology: tpu7x:2x2x1
jax: 0.10.0
libtpu: 0.0.40
codegen_flags: <defaults>
</compile_context>

<pallas_src>
import functools

import jax
import jax.numpy as jnp
import numpy as np
from jax.experimental import pallas as pl
from jax.experimental.pallas import tpu as pltpu


def _spatial_attention_kernel(x_ref, w_ref, o_ref, *, inv_c):
    """x_ref: (Nb, C, HW); w_ref: (2*HW, HW) bf16 folded conv; o_ref: (Nb, HW)."""
    x = x_ref[...].astype(jnp.float32)                       # (Nb, C, HW)

    # Vectorized channel reduction (mean & max over C, the sublane axis).
    avg = jnp.sum(x, axis=1) * inv_c                          # (Nb, HW) f32
    mx = jnp.max(x, axis=1)                                   # (Nb, HW) f32

    # Fused conv: one lane-dense bf16 MXU matmul with f32 accumulation.
    # LHS lane-concat is at a 256-lane (vreg-aligned) boundary.
    lhs = jnp.concatenate([avg, mx], axis=-1).astype(jnp.bfloat16)   # (Nb, 2*HW)
    conv = jnp.dot(lhs, w_ref[...], preferred_element_type=jnp.float32)  # (Nb, HW)

    # Sigmoid on the EUP; store is lane-dense (HW multiple of 128).
    o_ref[...] = jax.nn.sigmoid(conv).astype(o_ref.dtype)


@functools.lru_cache(maxsize=None)
def _fold_structure(H, W, K, pad):
    """Static (host/numpy) gather indices + zero-padding mask for the fold."""
    kh = np.arange(H)[:, None] - np.arange(H)[None, :] + pad      # (H_in, H_out)
    kw = np.arange(W)[:, None] - np.arange(W)[None, :] + pad      # (W_in, W_out)
    valid = (((kh >= 0) & (kh < K))[:, None, :, None]
             & ((kw >= 0) & (kw < K))[None, :, None, :])          # (Hi, Wi, Ho, Wo)
    khc = np.clip(kh, 0, K - 1)
    kwc = np.clip(kw, 0, K - 1)
    return khc, kwc, valid


def _fold_conv_weights(conv_weight, H, W, K, pad):
    """Fold the (1, 2, K, K) zero-padded 'same' conv into a single row-stacked
    dense matrix [T_avg ; T_max] of shape (2*HW, HW) in bf16, so that
    out_flat = concat([avg_flat, max_flat], -1) @ T_stacked  (f32 accumulate),
    with row-major spatial flattening (index = h * W + w)."""
    khc, kwc, valid = _fold_structure(H, W, K, pad)
    w = conv_weight.astype(jnp.float32)[0]                          # (2, K, K)
    # gathered[c, hi, wi, ho, wo] = weight[0, c, hi - ho + pad, wi - wo + pad]
    gathered = w[:, khc[:, None, :, None], kwc[None, :, None, :]]   # (2, Hi, Wi, Ho, Wo)
    t = jnp.where(jnp.asarray(valid)[None], gathered, 0.0)          # zero padding
    t = t.reshape(2 * H * W, H * W)                                 # [T_avg ; T_max]
    return t.astype(jnp.bfloat16)


def make_spatial_attention(conv_weight, spatial_shape, *, kernel_size=7):
    """Fold the conv weights once (module-init style) and return apply(x)."""
    assert kernel_size in (3, 7), "kernel size must be 3 or 7"
    pad = 3 if kernel_size == 7 else 1
    H, W = spatial_shape
    HW = H * W

    # Weight fold hoisted out of the per-call path (runs once, on device).
    w_stacked = _fold_conv_weights(conv_weight, H, W, kernel_size, pad)  # (2*HW, HW) bf16

    # VMEM guard: folded weights scale as (HW)^2; 2x for default double-buffer.
    w_bytes = 2 * HW * HW * 2  # bf16
    if 2 * w_bytes > 24 * 1024 * 1024:
        raise NotImplementedError(
            "Folded-conv matrix too large for VMEM at this feature-map size; "
            "use a 49-tap shifted-add (pltpu.roll) spatial conv instead.")

    def apply(x):
        N, C, xh, xw = x.shape
        assert (xh, xw) == (H, W), "feature-map size must match the fold"

        # Batch tile: multiple of 8 (unmasked sublane stores, megacore-parallel
        # grid on v7x) or the full batch when it is smaller than 8.
        nb = N if N <= 8 else 8
        grid = (pl.cdiv(N, nb),)

        # Lane-dense layout: spatial dims folded onto the lane axis.
        # Keep the upstream dtype (bf16 activations stay half-width over DMA);
        # the kernel upcasts to f32 for the reduction.
        x_flat = x.reshape(N, C, HW)

        kernel = functools.partial(_spatial_attention_kernel, inv_c=1.0 / C)

        out_flat = pl.pallas_call(
            kernel,
            out_shape=jax.ShapeDtypeStruct((N, HW), x.dtype),
            grid=grid,
            in_specs=[
                pl.BlockSpec((nb, C, HW), lambda b: (b, 0, 0)),     # activations
                pl.BlockSpec((2 * HW, HW), lambda b: (0, 0)),       # folded weights (resident)
            ],
            out_specs=pl.BlockSpec((nb, HW), lambda b: (b, 0)),
            compiler_params=pltpu.CompilerParams(
                dimension_semantics=("parallel",)),
        )(x_flat, w_stacked)

        return out_flat.reshape(N, 1, H, W)

    return apply


def spatial_attention(x, conv_weight, *, kernel_size=7):
    """One-shot convenience wrapper (folds weights per call; prefer the
    make_spatial_attention factory for repeated use with fixed weights)."""
    _, _, H, W = x.shape
    return make_spatial_attention(conv_weight, (H, W), kernel_size=kernel_size)(x)


def _reference(x, conv_weight):
    K = conv_weight.shape[-1]
    pad = (K - 1) // 2
    avg = jnp.mean(x, axis=1, keepdims=True)
    mx = jnp.max(x, axis=1, keepdims=True)
    cat = jnp.concatenate([avg, mx], axis=1)
    out = jax.lax.conv_general_dilated(
        cat, conv_weight, window_strides=(1, 1),
        padding=((pad, pad), (pad, pad)),
        dimension_numbers=("NCHW", "OIHW", "NCHW"))
    return jax.nn.sigmoid(out)


if __name__ == "__main__":
    key = jax.random.PRNGKey(0)
    k_x, k_w = jax.random.split(key)

    # Small shapes consistent with the module's forward.
    N, C, H, W = 2, 4, 16, 16
    x = jax.random.normal(k_x, (N, C, H, W), dtype=jnp.float32)

    # Deterministic synthetic weights (shape of nn.Conv2d(2, 1, 7, bias=False)).
    conv_weight = 0.1 * jax.random.normal(k_w, (1, 2, 7, 7), dtype=jnp.float32)

    # Fold once (module-init style), then apply.
    attn = make_spatial_attention(conv_weight, (H, W), kernel_size=7)
    out = jax.block_until_ready(attn(x))
    ref = jax.block_until_ready(_reference(x, conv_weight))

    assert out.shape == (N, 1, H, W)
    # Tolerance accounts for the bf16 matmul operands (f32 accumulation):
    # ~98 bf16-rounded products per output, sigmoid-bounded, stays well
    # within 5e-3 absolute on [0, 1] outputs.
    np.testing.assert_allclose(np.asarray(out), np.asarray(ref), atol=5e-3, rtol=5e-3)

    print("KERNEL_OK")
</pallas_src>

<mosaic_0001>
module attributes {stable_mosaic.version = 11 : i64} {
  func.func @_spatial_attention_kernel(%arg0: i32, %arg1: memref<2x4x256xf32, #tpu.memory_space<vmem>>, %arg2: memref<512x256xbf16, #tpu.memory_space<vmem>>, %arg3: memref<2x256xf32, #tpu.memory_space<vmem>>) attributes {dimension_semantics = [#tpu.dimension_semantics<parallel>], iteration_bounds = array<i64: 1>, scalar_prefetch = 0 : i64, scratch_operands = 0 : i64, tpu.core_type = #tpu.core_type<tc>, window_params = [{transform_indices = @transform_0, window_bounds = array<i64: 2, 4, 256>}, {pipeline_mode = #tpu.pipeline_mode<synchronous>, transform_indices = @transform_1, window_bounds = array<i64: 512, 256>}, {transform_indices = @transform_2, window_bounds = array<i64: 2, 256>}]} {
    %c0 = arith.constant 0 : index
    %c0_0 = arith.constant 0 : index
    %c0_1 = arith.constant 0 : index
    %0 = vector.load %arg1[%c0, %c0_0, %c0_1] : memref<2x4x256xf32, #tpu.memory_space<vmem>>, vector<2x4x256xf32>
    %cst = arith.constant dense<0.000000e+00> : vector<2x256xf32>
    %1 = vector.multi_reduction <add>, %0, %cst [1] : vector<2x4x256xf32> to vector<2x256xf32>
    %cst_2 = arith.constant 2.500000e-01 : f32
    %2 = vector.broadcast %cst_2 : f32 to vector<2x256xf32>
    %3 = arith.mulf %1, %2 : vector<2x256xf32>
    %cst_3 = arith.constant dense<0xFF800000> : vector<2x256xf32>
    %4 = vector.multi_reduction <maximumf>, %0, %cst_3 [1] : vector<2x4x256xf32> to vector<2x256xf32>
    %5 = tpu.concatenate %3, %4 in 1 : vector<2x256xf32>, vector<2x256xf32> -> vector<2x512xf32>
    %6 = arith.truncf %5 : vector<2x512xf32> to vector<2x512xbf16>
    %c0_4 = arith.constant 0 : index
    %c0_5 = arith.constant 0 : index
    %7 = vector.load %arg2[%c0_4, %c0_5] : memref<512x256xbf16, #tpu.memory_space<vmem>>, vector<512x256xbf16>
    %cst_6 = arith.constant dense<0.000000e+00> : vector<2x256xf32>
    %8 = tpu.matmul %6, %7, %cst_6 {dimension_numbers = #tpu.dot_dimension_numbers<[1], [0], [0], [1], [0, 0, 1, 1], [], []>} : vector<2x512xbf16>, vector<512x256xbf16>, vector<2x256xf32> -> vector<2x256xf32>
    %9 = arith.negf %8 : vector<2x256xf32>
    %10 = math.exp %9 : vector<2x256xf32>
    %cst_7 = arith.constant 1.000000e+00 : f32
    %11 = vector.broadcast %cst_7 : f32 to vector<2x256xf32>
    %12 = arith.addf %11, %10 : vector<2x256xf32>
    %13 = arith.divf %11, %12 : vector<2x256xf32>
    %c0_8 = arith.constant 0 : index
    %c0_9 = arith.constant 0 : index
    %14 = vector.load %arg3[%c0_8, %c0_9] : memref<2x256xf32, #tpu.memory_space<vmem>>, vector<2x256xf32>
    tpu.vector_store %arg3[%c0_8, %c0_9], %13 {strides = array<i32>} : memref<2x256xf32, #tpu.memory_space<vmem>>, vector<2x256xf32>,
    return
  }
  func.func @transform_0(%arg0: i32) -> (i32, i32, i32) {
    %c0_i32 = arith.constant 0 : i32
    %c0_i32_0 = arith.constant 0 : i32
    %c0_i32_1 = arith.constant 0 : i32
    return %arg0, %c0_i32, %c0_i32_0 : i32, i32, i32
  }
  func.func @transform_1(%arg0: i32) -> (i32, i32) {
    %c0_i32 = arith.constant 0 : i32
    %c0_i32_0 = arith.constant 0 : i32
    %c0_i32_1 = arith.constant 0 : i32
    return %c0_i32, %c0_i32_0 : i32, i32
  }
  func.func @transform_2(%arg0: i32) -> (i32, i32) {
    %c0_i32 = arith.constant 0 : i32
    %c0_i32_0 = arith.constant 0 : i32
    return %arg0, %c0_i32 : i32, i32
  }
}

</mosaic_0001>

<bundles_post_ra>
// kernel: tpu_custom_call.1
= control target key start
LH: loop header
LB: loop body
LE: loop exit
PB: predicated region body
PF: predicated region fallthrough
CT: control target
= control target key end

     0   :  { %7 = vsyncpa [#allocation3], 0  ;;  %s956_s0 = inlined_call_operand.hbm [shape: f32[2,4,256], index: 0, kind: input, shape index: {}]   ;;  %s957_s1 = inlined_call_operand.hbm [shape: bf16[512,256], index: 1, kind: input, shape index: {}]   ;;  %s958_s2 = inlined_call_operand.hbm [shape: f32[2,256], index: 2, kind: output, shape index: {}]  }
   0x1   :  { %8 = vsyncpa [#allocation6], 0 }
   0x2   :  { %9 = vsyncpa [#allocation4], 0  ;;  %s888_s9 = smov [#allocation2]   ;;  %s816_s13 = scalar_lea.hbm %s956_s0, 256 }
   0x3   :  { %s15_s10 = sshll.u32 %s888_s9, 4  ;;  %p817_p0 = scmp.ne.s32.totalorder %s956_s0, %s816_s13  ;;  %s16_s10 = int_to_ptr.vmem [resolvable:$true] %s15_s10 }
   0x4   :  { %p820_p1 = scmp.lt.u32.totalorder %s816_s13, %s956_s0 }
   0x6   :  { %p822_p2 = pnand %p820_p1, %p817_p0 }
   0x8   :  { %825 = shalt.err (!%p822_p2)
}
   0x9   :  { %s826_s18 = scalar_lea.vmem %s16_s10, 256  ;;  %p831_p4 = scmp.lt.s32.totalorder %s16_s10, %s16_s10 }
   0xa   :  { %p827_p3 = scmp.ne.s32.totalorder %s16_s10, %s826_s18  ;;  %p832_p5 = scmp.lt.s32.totalorder %s826_s18, %s826_s18 }
   0xc   :  { %p833_p6 = por %p832_p5, %p831_p4 }
   0xe   :  { %p834_p7 = pnand %p833_p6, %p827_p3 }
  0x10   :  { %837 = shalt.err (!%p834_p7)
}
  0x11   :  { %s889_s19 = smov 128   ;;  %s890_s20 = smov 8  }
  0x12   :  { %21 = dma.hbm_to_vmem [thread:$0]  %s956_s0, 256, %s16_s10, [#allocation3], %s889_s19, %s889_s19, %s890_s20  }
  0x13   :  { %s891_s23 = smov [#allocation5]   ;;  %s838_s27 = scalar_lea.hbm %s957_s1, 8192 }
  0x14   :  { %s27_s24 = sshll.u32 %s891_s23, 4  ;;  %p839_p8 = scmp.ne.s32.totalorder %s957_s1, %s838_s27  ;;  %s28_s24 = int_to_ptr.vmem [resolvable:$true] %s27_s24 }
  0x15   :  { %p842_p9 = scmp.lt.u32.totalorder %s838_s27, %s957_s1 }
  0x17   :  { %p844_p10 = pnand %p842_p9, %p839_p8 }
  0x19   :  { %847 = shalt.err (!%p844_p10)
}
  0x1a   :  { %s848_s4 = scalar_lea.vmem %s28_s24, 8192  ;;  %p853_p12 = scmp.lt.s32.totalorder %s28_s24, %s28_s24 }
  0x1b   :  { %p849_p11 = scmp.ne.s32.totalorder %s28_s24, %s848_s4  ;;  %p854_p13 = scmp.lt.s32.totalorder %s848_s4, %s848_s4 }
  0x1d   :  { %p855_p0 = por %p854_p13, %p853_p12 }
  0x1f   :  { %p856_p1 = pnand %p855_p0, %p849_p11 }
  0x21   :  { %859 = shalt.err (!%p856_p1)
}
  0x22   :  { %33 = dma.hbm_to_vmem [thread:$0]  %s957_s1, 8192, %s28_s24, [#allocation6], %s889_s19, %s889_s19, %s890_s20  }
  0x23   :  { %882 = dma.done.wait [#allocation3], 256  }
  0x24   :  { %883 = vsyncadd [#allocation3], 4294967040 }
  0x25   :  { %884 = dma.done.wait [#allocation6], 8192  }
  0x26   :  { %885 = vsyncadd [#allocation6], 4294959104  ;;  %v710_v0 = vld [vmem:[#allocation5 + $0x4] ss:$8 sps:$4 sm:$0xff]   ;;  %v714_v2 = vld [vmem:[#allocation5] ss:$8 sps:$4 sm:$0xff]  }
  0x27   :  { %v712_v1 = vld [vmem:[#allocation5 + $0x104] ss:$8 sps:$4 sm:$0xff]   ;;  %514 = vmatprep.subr.bf16.mxu1 %v710_v0  ;;  %v715_v3 = vld [vmem:[#allocation5 + $0x100] ss:$8 sps:$4 sm:$0xff]   ;;  %v716_v4 = vld [vmem:[#allocation5 + $0x14] ss:$8 sps:$4 sm:$0xff]  }
  0x28   :  { %555 = vmatprep.subr.bf16.mxu0 %v712_v1  ;;  %515 = vmatpush1.bf16.msra.mxu1 %v714_v2  ;;  %v718_v5 = vld [vmem:[#allocation5 + $0x114] ss:$8 sps:$4 sm:$0xff]   ;;  %v720_v6 = vld [vmem:[#allocation5 + $0x10] ss:$8 sps:$4 sm:$0xff]   ;;  %v722_v8 = vld [vmem:[#allocation5 + $0x24] ss:$8 sps:$4 sm:$0xff]  }
  0x29   :  { %556 = vmatpush1.bf16.msra.mxu0 %v715_v3  ;;  %516 = vmatprep.subr.bf16.mxu1 %v716_v4  ;;  %v721_v7 = vld [vmem:[#allocation5 + $0x110] ss:$8 sps:$4 sm:$0xff]   ;;  %v724_v9 = vld [vmem:[#allocation5 + $0x124] ss:$8 sps:$4 sm:$0xff]   ;;  %v726_v10 = vld [vmem:[#allocation5 + $0x20] ss:$8 sps:$4 sm:$0xff]  }
  0x2a   :  { %557 = vmatprep.subr.bf16.mxu0 %v718_v5  ;;  %v727_v11 = vld [vmem:[#allocation5 + $0x120] ss:$8 sps:$4 sm:$0xff]   ;;  %v728_v12 = vld [vmem:[#allocation5 + $0x34] ss:$8 sps:$4 sm:$0xff]   ;;  %v732_v14 = vld [vmem:[#allocation5 + $0x30] ss:$8 sps:$4 sm:$0xff]  }
  0x2b   :  { %v730_v13 = vld [vmem:[#allocation5 + $0x134] ss:$8 sps:$4 sm:$0xff]   ;;  %v733_v15 = vld [vmem:[#allocation5 + $0x130] ss:$8 sps:$4 sm:$0xff]   ;;  %v734_v16 = vld [vmem:[#allocation5 + $0x44] ss:$8 sps:$4 sm:$0xff]  }
  0x2c   :  { %517 = vmatpush1.bf16.msra.mxu1 %v720_v6  ;;  %v736_v17 = vld [vmem:[#allocation5 + $0x144] ss:$8 sps:$4 sm:$0xff]   ;;  %v738_v18 = vld [vmem:[#allocation5 + $0x40] ss:$8 sps:$4 sm:$0xff]   ;;  %v740_v20 = vld [vmem:[#allocation5 + $0x54] ss:$8 sps:$4 sm:$0xff]  }
  0x2d   :  { %558 = vmatpush1.bf16.msra.mxu0 %v721_v7  ;;  %518 = vmatprep.subr.bf16.mxu1 %v722_v8  ;;  %v739_v19 = vld [vmem:[#allocation5 + $0x140] ss:$8 sps:$4 sm:$0xff]   ;;  %v742_v21 = vld [vmem:[#allocation5 + $0x154] ss:$8 sps:$4 sm:$0xff]   ;;  %v744_v22 = vld [vmem:[#allocation5 + $0x50] ss:$8 sps:$4 sm:$0xff]  }
  0x2e   :  { %559 = vmatprep.subr.bf16.mxu0 %v724_v9  ;;  %v745_v23 = vld [vmem:[#allocation5 + $0x150] ss:$8 sps:$4 sm:$0xff]   ;;  %v746_v24 = vld [vmem:[#allocation5 + $0x64] ss:$8 sps:$4 sm:$0xff]   ;;  %v750_v26 = vld [vmem:[#allocation5 + $0x60] ss:$8 sps:$4 sm:$0xff]  }
  0x2f   :  { %v748_v25 = vld [vmem:[#allocation5 + $0x164] ss:$8 sps:$4 sm:$0xff]   ;;  %v751_v27 = vld [vmem:[#allocation5 + $0x160] ss:$8 sps:$4 sm:$0xff]   ;;  %v752_v28 = vld [vmem:[#allocation5 + $0x74] ss:$8 sps:$4 sm:$0xff]  }
  0x30   :  { %519 = vmatpush1.bf16.msra.mxu1 %v726_v10  ;;  %v754_v29 = vld [vmem:[#allocation5 + $0x174] ss:$8 sps:$4 sm:$0xff]   ;;  %v756_v30 = vld [vmem:[#allocation5 + $0x70] ss:$8 sps:$4 sm:$0xff]   ;;  %v758_v32 = vld [vmem:[#allocation5 + $0x84] ss:$8 sps:$4 sm:$0xff]  }
  0x31   :  { %560 = vmatpush1.bf16.msra.mxu0 %v727_v11  ;;  %520 = vmatprep.subr.bf16.mxu1 %v728_v12  ;;  %v757_v31 = vld [vmem:[#allocation5 + $0x170] ss:$8 sps:$4 sm:$0xff]   ;;  %v760_v33 = vld [vmem:[#allocation5 + $0x184] ss:$8 sps:$4 sm:$0xff]   ;;  %v762_v34 = vld [vmem:[#allocation5 + $0x80] ss:$8 sps:$4 sm:$0xff]  }
  0x32   :  { %561 = vmatprep.subr.bf16.mxu0 %v730_v13  ;;  %v763_v35 = vld [vmem:[#allocation5 + $0x180] ss:$8 sps:$4 sm:$0xff]   ;;  %v764_v36 = vld [vmem:[#allocation5 + $0x94] ss:$8 sps:$4 sm:$0xff]   ;;  %v768_v38 = vld [vmem:[#allocation5 + $0x90] ss:$8 sps:$4 sm:$0xff]  }
  0x33   :  { %v766_v37 = vld [vmem:[#allocation5 + $0x194] ss:$8 sps:$4 sm:$0xff]   ;;  %v769_v39 = vld [vmem:[#allocation5 + $0x190] ss:$8 sps:$4 sm:$0xff]   ;;  %v770_v40 = vld [vmem:[#allocation5 + $0xa4] ss:$8 sps:$4 sm:$0xff]  }
  0x34   :  { %521 = vmatpush1.bf16.msra.mxu1 %v732_v14  ;;  %v772_v41 = vld [vmem:[#allocation5 + $0x1a4] ss:$8 sps:$4 sm:$0xff]   ;;  %v774_v42 = vld [vmem:[#allocation5 + $0xa0] ss:$8 sps:$4 sm:$0xff]   ;;  %v776_v44 = vld [vmem:[#allocation5 + $0xb4] ss:$8 sps:$4 sm:$0xff]  }
  0x35   :  { %562 = vmatpush1.bf16.msra.mxu0 %v733_v15  ;;  %522 = vmatprep.subr.bf16.mxu1 %v734_v16  ;;  %v775_v43 = vld [vmem:[#allocation5 + $0x1a0] ss:$8 sps:$4 sm:$0xff]   ;;  %vm48_vm0 = vcmask 1043456   ;;  %v778_v45 = vld [vmem:[#allocation5 + $0x1b4] ss:$8 sps:$4 sm:$0xff]   ;;  %vm113_vm1 = vcmask 1041409  }
  0x36   :  { %563 = vmatprep.subr.bf16.mxu0 %v736_v17  ;;  %v780_v46 = vld [vmem:[#allocation5 + $0xb0] ss:$8 sps:$4 sm:$0xff]   ;;  %v782_v53 = vld [vmem:[#allocation5 + $0xc4] ss:$8 sps:$4 sm:$0xff]   ;;  %v786_v7 = vld [vmem:[#allocation5 + $0xc0] ss:$8 sps:$4 sm:$0xff]  }
  0x37   :  { %v40_v47 = vld [vmem:[#allocation2] sm:$0xff]  ;;  %v41_v49 = vld [vmem:[#allocation2 + $0x8] sm:$0xff]  ;;  %v784_v58 = vld [vmem:[#allocation5 + $0x1c4] ss:$8 sps:$4 sm:$0xff]   ;;  %s892_s1 = smov [#allocation7]  }
  0x38   :  { %523 = vmatpush1.bf16.msra.mxu1 %v738_v18  ;;  %v781_v48 = vld [vmem:[#allocation5 + $0x1b0] ss:$8 sps:$4 sm:$0xff]   ;;  %v44_v50 = vcombine.high %v40_v47, %v40_v47  ;;  %v49_v51 = vsel %vm48_vm0, %v40_v47, 0.0  ;;  %v81_v52 = vsel %vm48_vm0, %v40_v47, -inf  ;;  %v45_v54 = vcombine.high %v41_v49, %v41_v49  ;;  %v787_v8 = vld [vmem:[#allocation5 + $0x1c0] ss:$8 sps:$4 sm:$0xff]  }
  0x39   :  { %564 = vmatpush1.bf16.msra.mxu0 %v739_v19  ;;  %524 = vmatprep.subr.bf16.mxu1 %v740_v20  ;;  %v50_v55 = vrot.slane %v49_v51, 4  ;;  %v63_v56 = vsel %vm48_vm0, %v41_v49, 0.0  ;;  %v82_v57 = vrot.slane %v81_v52, 4  ;;  %v95_v62 = vsel %vm48_vm0, %v41_v49, -inf  ;;  %v788_v13 = vld [vmem:[#allocation5 + $0xd4] ss:$8 sps:$4 sm:$0xff]  }
  0x3a   :  { %565 = vmatprep.subr.bf16.mxu0 %v742_v21  ;;  %v56_v59 = vsel %vm48_vm0, %v44_v50, 0.0  ;;  %v88_v60 = vsel %vm48_vm0, %v44_v50, -inf  ;;  %v64_v61 = vrot.slane %v63_v56, 4  ;;  %v70_v0 = vsel %vm48_vm0, %v45_v54, 0.0  ;;  %v790_v14 = vld [vmem:[#allocation5 + $0x1d4] ss:$8 sps:$4 sm:$0xff]  }
  0x3b   :  { %v57_v63 = vrot.slane %v56_v59, 4  ;;  %v89_v1 = vrot.slane %v88_v60, 4  ;;  %v102_v2 = vsel %vm48_vm0, %v45_v54, -inf  ;;  %v71_v3 = vrot.slane %v70_v0, 4  ;;  %v798_v47 = vld [vmem:[#allocation5 + $0xe0] ss:$8 sps:$4 sm:$0xff]  }
  0x3c   :  { %525 = vmatpush1.bf16.msra.mxu1 %v744_v22  ;;  %v103_v4 = vrot.slane %v102_v2, 4  ;;  %v51_v5 = vadd.f32 %v50_v55, %v49_v51  ;;  %v65_v6 = vadd.f32 %v64_v61, %v63_v56  ;;  %v83_v11 = vmax.f32 %v81_v52, %v82_v57  ;;  %v802_v54 = vld [vmem:[#allocation5 + $0x1f4] ss:$8 sps:$4 sm:$0xff]   ;;  %s626_s6 = sshll.u32 %s892_s1, 4  ;;  %s627_s6 = int_to_ptr.vmem [resolvable:$true] %s626_s6 }
  0x3d   :  { %566 = vmatpush1.bf16.msra.mxu0 %v745_v23  ;;  %526 = vmatprep.subr.bf16.mxu1 %v746_v24  ;;  %v58_v9 = vadd.f32 %v57_v63, %v56_v59  ;;  %v90_v10 = vmax.f32 %v88_v60, %v89_v1  ;;  %v96_v12 = vrot.slane %v95_v62, 4  ;;  %v72_v15 = vadd.f32 %v71_v3, %v70_v0  ;;  %v804_v63 = vld [vmem:[#allocation5 + $0xf0] ss:$8 sps:$4 sm:$0xff]   ;;  %s860_s7 = scalar_lea.vmem %s627_s6, 64  ;;  %p865_p3 = scmp.lt.s32.totalorder %s627_s6, %s627_s6 }
  0x3e   :  { %567 = vmatprep.subr.bf16.mxu0 %v748_v25  ;;  %v104_v16 = vmax.f32 %v102_v2, %v103_v4  ;;  %v52_v17 = vrot.slane %v51_v5, 2  ;;  %v66_v18 = vrot.slane %v65_v6, 2  ;;  %v84_v21 = vrot.slane %v83_v11, 2  ;;  %v805_v0 = vld [vmem:[#allocation5 + $0x1f0] ss:$8 sps:$4 sm:$0xff]   ;;  %p861_p2 = scmp.ne.s32.totalorder %s627_s6, %s860_s7  ;;  %p866_p4 = scmp.lt.s32.totalorder %s860_s7, %s860_s7 }
  0x3f   :  { %v59_v19 = vrot.slane %v58_v9, 2  ;;  %v91_v20 = vrot.slane %v90_v10, 2  ;;  %v97_v22 = vmax.f32 %v95_v62, %v96_v12  ;;  %v73_v23 = vrot.slane %v72_v15, 2 }
  0x40   :  { %527 = vmatpush1.bf16.msra.mxu1 %v750_v26  ;;  %v105_v24 = vrot.slane %v104_v16, 2  ;;  %v53_v25 = vadd.f32 %v52_v17, %v51_v5  ;;  %v67_v26 = vadd.f32 %v66_v18, %v65_v6  ;;  %p867_p5 = por %p866_p4, %p865_p3 }
  0x41   :  { %568 = vmatpush1.bf16.msra.mxu0 %v751_v27  ;;  %528 = vmatprep.subr.bf16.mxu1 %v752_v28  ;;  %v792_v27 = vld [vmem:[#allocation5 + $0xd0] ss:$8 sps:$4 sm:$0xff]  }
  0x42   :  { %569 = vmatprep.subr.bf16.mxu0 %v754_v29  ;;  %v793_v28 = vld [vmem:[#allocation5 + $0x1d0] ss:$8 sps:$4 sm:$0xff]   ;;  %v60_v29 = vadd.f32 %v59_v19, %v58_v9  ;;  %p868_p6 = pnand %p867_p5, %p861_p2 }
  0x44   :  { %529 = vmatpush1.bf16.msra.mxu1 %v756_v30  ;;  %v92_v30 = vmax.f32 %v90_v10, %v91_v20 }
  0x45   :  { %570 = vmatpush1.bf16.msra.mxu0 %v757_v31  ;;  %530 = vmatprep.subr.bf16.mxu1 %v758_v32  ;;  %v85_v31 = vmax.f32 %v83_v11, %v84_v21  ;;  %v98_v32 = vrot.slane %v97_v22, 2 }
  0x46   :  { %571 = vmatprep.subr.bf16.mxu0 %v760_v33  ;;  %v794_v33 = vld [vmem:[#allocation5 + $0xe4] ss:$8 sps:$4 sm:$0xff]  }
  0x48   :  { %531 = vmatpush1.bf16.msra.mxu1 %v762_v34  ;;  %v796_v34 = vld [vmem:[#allocation5 + $0x1e4] ss:$8 sps:$4 sm:$0xff]  }
  0x49   :  { %572 = vmatpush1.bf16.msra.mxu0 %v763_v35  ;;  %532 = vmatprep.subr.bf16.mxu1 %v764_v36  ;;  %v74_v35 = vadd.f32 %v73_v23, %v72_v15  ;;  %v106_v36 = vmax.f32 %v104_v16, %v105_v24 }
  0x4a   :  { %573 = vmatprep.subr.bf16.mxu0 %v766_v37  ;;  %v54_v37 = vrot.slane %v53_v25, 1 }
  0x4c   :  { %533 = vmatpush1.bf16.msra.mxu1 %v768_v38  ;;  %v68_v38 = vrot.slane %v67_v26, 1 }
  0x4d   :  { %574 = vmatpush1.bf16.msra.mxu0 %v769_v39  ;;  %534 = vmatprep.subr.bf16.mxu1 %v770_v40  ;;  %v61_v39 = vrot.slane %v60_v29, 1  ;;  %v93_v40 = vrot.slane %v92_v30, 1 }
  0x4e   :  { %575 = vmatprep.subr.bf16.mxu0 %v772_v41  ;;  %v86_v41 = vrot.slane %v85_v31, 1 }
  0x4f   :  { %v62_v49 = vadd.f32 %v61_v39, %v60_v29  ;;  %v94_v50 = vmax.f32 %v92_v30, %v93_v40 }
  0x50   :  { %535 = vmatpush1.bf16.msra.mxu1 %v774_v42  ;;  %v99_v42 = vmax.f32 %v97_v22, %v98_v32  ;;  %v87_v51 = vmax.f32 %v85_v31, %v86_v41 }
  0x51   :  { %576 = vmatpush1.bf16.msra.mxu0 %v775_v43  ;;  %536 = vmatprep.subr.bf16.mxu1 %v776_v44  ;;  %v75_v43 = vrot.slane %v74_v35, 1  ;;  %v107_v44 = vrot.slane %v106_v36, 1  ;;  %v78_v59 = vmul.f32 0.25, %v62_v49 }
  0x52   :  { %577 = vmatprep.subr.bf16.mxu0 %v778_v45  ;;  %v55_v45 = vadd.f32 %v54_v37, %v53_v25  ;;  %v100_v52 = vrot.slane %v99_v42, 1 }
  0x53   :  { %v76_v55 = vadd.f32 %v75_v43, %v74_v35  ;;  %v108_v56 = vmax.f32 %v106_v36, %v107_v44 }
  0x54   :  { %537 = vmatpush1.bf16.msra.mxu1 %v780_v46  ;;  %v69_v46 = vadd.f32 %v68_v38, %v67_v26  ;;  %v77_v57 = vmul.f32 0.25, %v55_v45  ;;  %v101_v60 = vmax.f32 %v99_v42, %v100_v52 }
  0x55   :  { %578 = vmatpush1.bf16.msra.mxu0 %v781_v48  ;;  %538 = vmatprep.subr.bf16.mxu1 %v782_v53  ;;  %v799_v48 = vld [vmem:[#allocation5 + $0x1e0] ss:$8 sps:$4 sm:$0xff]   ;;  %v800_v53 = vld [vmem:[#allocation5 + $0xf4] ss:$8 sps:$4 sm:$0xff]   ;;  %v80_v61 = vmul.f32 0.25, %v76_v55  ;;  %v123_v62 = vsel %vm113_vm1, %v108_v56, %v94_v50 }
  0x56   :  { %579 = vmatprep.subr.bf16.mxu0 %v784_v58  ;;  %v79_v58 = vmul.f32 0.25, %v69_v46  ;;  %v129_v1 = vpack.c.bf16 %v123_v62, %v123_v62  ;;  %v122_v3 = vsel %vm113_vm1, %v101_v60, %v87_v51 }
  0x57   :  { %v115_v4 = vsel %vm113_vm1, %v80_v61, %v78_v59 }
  0x58   :  { %539 = vmatpush1.bf16.msra.mxu1 %v786_v7  ;;  %v114_v2 = vsel %vm113_vm1, %v79_v58, %v77_v57  ;;  %v127_v5 = vpack.c.bf16 %v115_v4, %v115_v4  ;;  %587 = vmatprep.mubr.bf16.mxu0 %v129_v1  ;;  %v128_v7 = vpack.c.bf16 %v122_v3, %v122_v3 }
  0x59   :  { %580 = vmatpush1.bf16.msra.mxu0 %v787_v8  ;;  %540 = vmatprep.subr.bf16.mxu1 %v788_v13  ;;  %v126_v6 = vpack.c.bf16 %v114_v2, %v114_v2 }
  0x5a   :  { %581 = vmatprep.subr.bf16.mxu0 %v790_v14  ;;  %546 = vmatprep.mubr.bf16.mxu1 %v127_v5 }
  0x5c   :  { %541 = vmatpush1.bf16.msra.mxu1 %v792_v27 }
  0x5d   :  { %582 = vmatpush1.bf16.msra.mxu0 %v793_v28  ;;  %542 = vmatprep.subr.bf16.mxu1 %v794_v33 }
  0x5e   :  { %583 = vmatprep.subr.bf16.mxu0 %v796_v34 }
  0x60   :  { %543 = vmatpush1.bf16.msra.mxu1 %v798_v47 }
  0x61   :  { %584 = vmatpush1.bf16.msra.mxu0 %v799_v48  ;;  %544 = vmatprep.subr.bf16.mxu1 %v800_v53 }
  0x62   :  { %585 = vmatprep.subr.bf16.mxu0 %v802_v54 }
  0x64   :  { %545 = vmatpush1.bf16.msra.mxu1 %v804_v63 }
  0x65   :  { %586 = vmatpush1.bf16.msra.mxu0 %v805_v0 }
  0x67   :  { %547 = vmatmul.mubr.bf16.vlgmr.msra.gmra.mrb[0].mxu1 %v126_v6 }
  0x68   :  { %588 = vmatmul.mubr.bf16.vlgmr.msra.gmra.mrb[0].mxu0 %v128_v7 }
 0x13a   :  { %v548_v8 = vpop.f32.mrb[0].mxu1 }
 0x13b   :  { %v589_v9 = vpop.f32.mrb[0].mxu0  ;;  %v550_v11 = vpop.f32.mrb[1].mxu1 }
 0x13c   :  { %v590_v10 = vadd.f32 %v589_v9, %v548_v8  ;;  %v591_v12 = vpop.f32.mrb[1].mxu0  ;;  %v552_v14 = vpop.f32.mrb[2].mxu1 }
 0x13d   :  { %v592_v13 = vadd.f32 %v591_v12, %v550_v11  ;;  %v593_v15 = vpop.f32.mrb[2].mxu0  ;;  %v553_v17 = vpop.f32.mrb[3].mxu1 }
 0x13e   :  { %v700_v16 = vmul.f32 -1.442695, %v590_v10  ;;  %v594_v18 = vpop.f32.mrb[3].mxu0 }
 0x13f   :  { %v701_v19 = vmul.f32 -1.442695, %v592_v13 }
 0x140   :  { %808 = vpow2.f32 %v700_v16 }
 0x141   :  { %810 = vpow2.f32 %v701_v19 }
 0x14a   :  { %v809_v20 = vpop.eup %808 }
 0x14b   :  { %v811_v21 = vpop.eup %810  ;;  %v602_v22 = vadd.f32 1.0, %v809_v20 }
 0x14c   :  { %v603_v23 = vadd.f32 1.0, %v811_v21 }
 0x14d   :  { %812 = vrcp.f32 %v602_v22 }
 0x14e   :  { %814 = vrcp.f32 %v603_v23 }
 0x157   :  { %v813_v24 = vpop.eup %812 }
 0x158   :  { %v815_v25 = vpop.eup %814 }
 0x159   :  { %v610_v26 = vcombine.low %v813_v24, %v815_v25 }
 0x15b   :  { %702 = vst.sshfl [vmem:[#allocation7] sm:$0x33 pattern:$0x76325410] %v610_v26 }
 0x15c   :  { %871 = shalt.err (!%p868_p6)
}
 0x15d   :  { %s872_s10 = scalar_lea.hbm %s958_s2, 64 }
 0x15e   :  { %p873_p7 = scmp.ne.s32.totalorder %s958_s2, %s872_s10  ;;  %p876_p8 = scmp.lt.u32.totalorder %s872_s10, %s958_s2 }
 0x160   :  { %p878_p9 = pnand %p876_p8, %p873_p7 }
 0x162   :  { %881 = shalt.err (!%p878_p9)
}
 0x163   :  { %629 = dma.vmem_to_hbm [thread:$0]  %s627_s6, 64, %s958_s2, [#allocation4]  }
 0x164   :  { %886 = dma.done.wait [#allocation4], 64  }
 0x165   :  { %887 = vsyncadd [#allocation4], 4294967232 }
 0x166   :  { %633 = vsyncpa [#allocation3], 1 }
 0x167   :  { %634 = vsyncpa [#allocation6], 1 }
 0x168   :  { %635 = vsyncpa [#allocation4], 1 }

</bundles_post_ra>
